<compile_context>
chip_gen: v6e
topology: v6e:2x2x1
jax: 0.10.0
libtpu: 0.0.40
codegen_flags: <defaults>
</compile_context>

<pallas_src>
import numpy as np
import jax
import jax.numpy as jnp
from jax.experimental import pallas as pl
from jax.experimental.pallas import tpu as pltpu

LANE = 128                 # TPU lane width: every feature axis is padded to this
_THRESH = 1.0 - 1e-07      # ACT halting threshold (same as reference)


def _vmem():
    return pl.BlockSpec(memory_space=pltpu.MemorySpace.VMEM)


def _smem():
    return pl.BlockSpec(memory_space=pltpu.MemorySpace.SMEM)


# ----------------------------- encoder / decoder -----------------------------

def _encoder_kernel(x_ref, w_ref, b_ref, o_ref):
    o_ref[...] = (
        jnp.dot(x_ref[...], w_ref[...], preferred_element_type=jnp.float32)
        + b_ref[...]
    )


@jax.jit
def encoder_fwd(x, w, b):
    return pl.pallas_call(
        _encoder_kernel,
        out_shape=jax.ShapeDtypeStruct((x.shape[0], w.shape[1]), jnp.float32),
        in_specs=[_vmem()] * 3,
        out_specs=_vmem(),
    )(x, w, b)


def _decoder_kernel(x_ref, w_ref, b_ref, o_ref):
    # All prediction heads in one call: w_ref is (P, 128, O), b_ref is (P, 1, O)
    x = x_ref[...]
    for p in range(w_ref.shape[0]):
        logits = jnp.dot(x, w_ref[p], preferred_element_type=jnp.float32) + b_ref[p]
        m = jnp.max(logits, axis=-1, keepdims=True)
        s = logits - m
        lse = jnp.log(jnp.sum(jnp.exp(s), axis=-1, keepdims=True))
        o_ref[p] = s - lse


@jax.jit
def decoder_fwd(x, w, b):
    return pl.pallas_call(
        _decoder_kernel,
        out_shape=jax.ShapeDtypeStruct((w.shape[0], x.shape[0], w.shape[2]),
                                       jnp.float32),
        in_specs=[_vmem()] * 3,
        out_specs=_vmem(),
    )(x, w, b)


# --------------------------- on-device ACT traversal -------------------------

def _build_traversal(num_nodes, num_starts, cap, deg_max, qmax, start_ids, hidden):
    """Builds a pallas_call running the full FIFO/ACT message traversal on TPU."""
    n, s_cnt, h = num_nodes, num_starts, hidden
    mslots = s_cnt + cap          # one message slot per processed message + starts

    def kernel(enc_ref, fmsg_ref, w1f_ref, w1m_ref, b1_ref,
               w2s_ref, w2m_ref, b2_ref,
               nb_flat_ref, nb_off_ref, nb_deg_ref,
               ff_ref,
               pred_ref, ta_ref, mstore_ref, flag_ref,
               qnode_ref, qmidx_ref, hdr_ref):
        # ----- init persistent per-node state -----
        pred_ref[...] = enc_ref[...]
        ff_ref[...] = jnp.zeros_like(ff_ref)
        ta_ref[...] = jnp.zeros_like(ta_ref)
        for k in range(s_cnt):                      # start ids are static
            mstore_ref[k] = fmsg_ref[k]
            qnode_ref[k] = jnp.int32(start_ids[k])
            qmidx_ref[k] = jnp.int32(k)
        hdr_ref[0] = jnp.int32(0)                   # head == #popped messages
        hdr_ref[1] = jnp.int32(s_cnt)               # tail

        lane = jax.lax.broadcasted_iota(jnp.int32, (1, LANE), 1)
        ns_mask = lane < h                          # newstate lanes
        act_col = (lane == h).astype(jnp.float32)   # fused act-logit lane

        def loop_body(_t, carry):
            head = hdr_ref[0]
            tail = hdr_ref[1]

            @pl.when(head < tail)                   # queue non-empty -> pop one
            def _():
                node = qnode_ref[head]
                midx = qmidx_ref[head]
                hdr_ref[0] = head + 1               # counts toward the n*10 cap

                ta = ta_ref[node]                   # (1, LANE), lane-uniform
                flag_ref[...] = (ta > _THRESH).astype(jnp.int32)

                @pl.when(flag_ref[0, 0] == 0)       # node not yet halted
                def _():
                    feat = pred_ref[node]           # (1, LANE)
                    msg = mstore_ref[midx]          # (1, LANE)
                    # fused [newstate | act] head (split-weight concat matmul)
                    z1 = (jnp.dot(feat, w1f_ref[...],
                                  preferred_element_type=jnp.float32)
                          + jnp.dot(msg, w1m_ref[...],
                                    preferred_element_type=jnp.float32)
                          + b1_ref[...])
                    newstate = jnp.where(ns_mask, jnp.maximum(z1, 0.0), 0.0)
                    logit = jnp.sum(z1 * act_col, axis=-1, keepdims=True)
                    cand = jax.nn.sigmoid(logit)                      # (1, 1)
                    new_act = jnp.where(ta + cand > 1.0, 1.0 - ta, cand)
                    newmsg = (jnp.dot(newstate, w2s_ref[...],
                                      preferred_element_type=jnp.float32)
                              + jnp.dot(msg, w2m_ref[...],
                                        preferred_element_type=jnp.float32)
                              + b2_ref[...])
                    # state updates (exactly like the reference)
                    pred_ref[node] = newstate
                    ff_ref[node] = ff_ref[node] + newstate * new_act
                    ta_ref[node] = ta + new_act
                    mstore_ref[s_cnt + head] = newmsg
                    # enqueue one entry per neighbour (shared message slot)
                    off = nb_off_ref[node]
                    deg = nb_deg_ref[node]
                    for j in range(deg_max):
                        qnode_ref[tail + j] = nb_flat_ref[off + j]
                        qmidx_ref[tail + j] = s_cnt + head
                    hdr_ref[1] = tail + deg
            return carry

        jax.lax.fori_loop(0, cap, loop_body, 0)

    fn = pl.pallas_call(
        kernel,
        out_shape=jax.ShapeDtypeStruct((n, 1, LANE), jnp.float32),
        in_specs=[_vmem()] * 8 + [_smem()] * 3,
        out_specs=_vmem(),
        scratch_shapes=[
            pltpu.VMEM((n, 1, LANE), jnp.float32),        # predictions (node state)
            pltpu.VMEM((n, 1, LANE), jnp.float32),        # total act (lane-broadcast)
            pltpu.VMEM((mslots, 1, LANE), jnp.float32),   # message store
            pltpu.VMEM((1, LANE), jnp.int32),             # halted-flag staging
            pltpu.SMEM((qmax,), jnp.int32),               # queue: node id
            pltpu.SMEM((qmax,), jnp.int32),               # queue: message slot
            pltpu.SMEM((2,), jnp.int32),                  # head / tail
        ],
    )
    return jax.jit(fn)


# ----------------------------------- module ----------------------------------

def _linear_params(key, fan_in, fan_out):
    # Matches torch.nn.Linear default init: U(-1/sqrt(fan_in), 1/sqrt(fan_in))
    kw, kb = jax.random.split(key)
    bound = 1.0 / np.sqrt(fan_in)
    w = jax.random.uniform(kw, (fan_in, fan_out), jnp.float32, -bound, bound)
    b = jax.random.uniform(kb, (1, fan_out), jnp.float32, -bound, bound)
    return w, b


def _pad2(a, rows, cols):
    out = jnp.zeros((rows, cols), jnp.float32)
    return out.at[: a.shape[0], : a.shape[1]].set(a)


class GwACACT:
    def __init__(self, in_features, hidden, out_features, num_predictions,
                 message_size, graph_class, key):
        self.hidden = hidden
        self.out_features = out_features
        self.message_size = message_size
        self.num_predictions = num_predictions
        self.graph_class = graph_class

        keys = jax.random.split(key, 4 + num_predictions)
        enc_w, enc_b = _linear_params(keys[0], in_features, hidden)
        ns_w, ns_b = _linear_params(keys[1], hidden + message_size, hidden)
        nm_w, nm_b = _linear_params(keys[2], hidden + message_size, message_size)
        act_w, act_b = _linear_params(keys[3], hidden + message_size, 1)
        decs = [_linear_params(keys[4 + p], hidden, out_features)
                for p in range(num_predictions)]

        # raw params kept for the host-side numerical reference check
        self._raw = dict(enc_w=enc_w, enc_b=enc_b, ns_w=ns_w, ns_b=ns_b,
                         nm_w=nm_w, nm_b=nm_b, act_w=act_w, act_b=act_b, dec=decs)

        h = hidden
        # lane-dense (128-padded) parameters for the Pallas kernels
        self.enc_w_p = _pad2(enc_w, in_features, LANE)
        self.enc_b_p = _pad2(enc_b, 1, LANE)
        # fused [newstate | act] head, split into features / message halves
        w1 = jnp.concatenate([ns_w, act_w], axis=1)          # (H+M, H+1)
        b1 = jnp.concatenate([ns_b, act_b], axis=1)          # (1, H+1)
        self.w1f = _pad2(w1[:h], LANE, LANE)
        self.w1m = _pad2(w1[h:], LANE, LANE)
        self.b1 = _pad2(b1, 1, LANE)
        self.w2s = _pad2(nm_w[:h], LANE, LANE)
        self.w2m = _pad2(nm_w[h:], LANE, LANE)
        self.b2 = _pad2(nm_b, 1, LANE)
        # stacked decoder heads
        self.dec_w = jnp.stack([_pad2(w, LANE, out_features) for w, _ in decs])
        self.dec_b = jnp.stack([b for _, b in decs])         # (P, 1, O)

        self._trav_cache = {}

    @staticmethod
    def neighbors(graph):
        nbs = {i: set() for i in range(graph["num_nodes"])}
        source, dest = graph["edge_index"]
        for node in range(graph["num_nodes"]):
            for i in range(len(source)):
                if int(source[i]) == node:
                    nbs[node].add(int(dest[i]))
                if int(dest[i]) == node:
                    nbs[node].add(int(source[i]))
        return nbs

    def _get_traversal(self, n, s_cnt, cap, deg_max, qmax, start_ids):
        key = (n, s_cnt, cap, deg_max, qmax, start_ids)
        if key not in self._trav_cache:
            self._trav_cache[key] = _build_traversal(
                n, s_cnt, cap, deg_max, qmax, start_ids, self.hidden)
        return self._trav_cache[key]

    def forward(self, graphs):
        lp = LANE
        # -------- batched encoder over all graphs (one pallas_call) --------
        xs = jnp.concatenate([g["xa"] for g in graphs], axis=0)
        r0 = xs.shape[0]
        rp = ((r0 + 7) // 8) * 8
        xs_p = jnp.zeros((rp, xs.shape[1]), jnp.float32).at[:r0].set(xs)
        enc_all = encoder_fwd(xs_p, self.enc_w_p, self.enc_b_p)   # (rp, 128)

        ff_rows = []
        row = 0
        for g in graphs:
            n = g["num_nodes"]
            nbs = self.neighbors(g)
            nb_lists = [list(nbs[i]) for i in range(n)]
            degs = [len(x) for x in nb_lists]
            deg_max = max(degs) if degs else 0
            offs = np.zeros(n, np.int32)
            if n > 1:
                offs[1:] = np.cumsum(degs, dtype=np.int64)[:-1]
            flat = [v for lst in nb_lists for v in lst] + [0] * max(deg_max, 1)
            start_ids = tuple(i for i, st in enumerate(g["starts"]) if st)
            s_cnt = len(start_ids)
            cap = n * 10
            qmax = max(1, s_cnt + cap * deg_max)

            enc_g = enc_all[row:row + n].reshape(n, 1, lp)
            row += n
            if s_cnt:
                fm = jnp.asarray(g["first_message"])[np.array(start_ids)]
                fm_p = jnp.zeros((s_cnt, lp), jnp.float32)
                fm_p = fm_p.at[:, :self.message_size].set(fm).reshape(s_cnt, 1, lp)
            else:
                fm_p = jnp.zeros((1, 1, lp), jnp.float32)

            trav = self._get_traversal(n, s_cnt, cap, deg_max, qmax, start_ids)
            ff = trav(enc_g, fm_p,
                      self.w1f, self.w1m, self.b1, self.w2s, self.w2m, self.b2,
                      jnp.asarray(flat, dtype=jnp.int32),
                      jnp.asarray(offs, dtype=jnp.int32),
                      jnp.asarray(degs, dtype=jnp.int32))
            ff = ff.reshape(n, lp)
            if self.graph_class:
                ff = jnp.sum(ff, axis=0, keepdims=True)
            ff_rows.append(ff)

        # -------- one decoder call for all graphs and all heads --------
        ff_all = jnp.concatenate(ff_rows, axis=0)                 # (R, 128)
        r = ff_all.shape[0]
        rp2 = ((r + 7) // 8) * 8
        ff_pad = jnp.zeros((rp2, lp), jnp.float32).at[:r].set(ff_all)
        dec = decoder_fwd(ff_pad, self.dec_w, self.dec_b)         # (P, rp2, O)
        return [dec[p, :r, :] for p in range(self.num_predictions)], 0


# --------------------------- host float32 reference --------------------------

def _reference_forward(model, graphs):
    raw = model._raw
    enc_w = np.asarray(raw["enc_w"], np.float32); enc_b = np.asarray(raw["enc_b"], np.float32)
    ns_w = np.asarray(raw["ns_w"], np.float32); ns_b = np.asarray(raw["ns_b"], np.float32)
    nm_w = np.asarray(raw["nm_w"], np.float32); nm_b = np.asarray(raw["nm_b"], np.float32)
    act_w = np.asarray(raw["act_w"], np.float32); act_b = np.asarray(raw["act_b"], np.float32)
    decs = [(np.asarray(w, np.float32), np.asarray(b, np.float32)) for w, b in raw["dec"]]
    p_cnt = model.num_predictions

    outs = {p: [] for p in range(p_cnt)}
    for g in graphs:
        nbs = model.neighbors(g)
        n = g["num_nodes"]
        xa = np.asarray(g["xa"], np.float32)
        fm = np.asarray(g["first_message"], np.float32)
        enc = xa @ enc_w + enc_b
        pred = {i: enc[i:i + 1] for i in range(n)}
        ta = {i: np.float32(0.0) for i in range(n)}
        ff = {i: np.zeros((1, model.hidden), np.float32) for i in range(n)}
        queue = []
        for i, st in enumerate(g["starts"]):
            if st:
                queue.append((i, fm[i:i + 1]))
        msgs = 0
        while queue and msgs < n * 10:
            msgs += 1
            node, message = queue.pop(0)
            feat = pred[node]
            if ta[node] > 1.0 - 1e-07:
                continue
            cat = np.concatenate([feat, message], axis=1)
            cand = np.float32((1.0 / (1.0 + np.exp(-(cat @ act_w + act_b))))[0, 0])
            new_act = np.float32(1.0 - ta[node]) if ta[node] + cand > 1.0 else cand
            newstate = np.maximum(cat @ ns_w + ns_b, 0.0).astype(np.float32)
            newmsg = (np.concatenate([newstate, message], axis=1) @ nm_w + nm_b
                      ).astype(np.float32)
            for nb in nbs[node]:
                queue.append((nb, newmsg))
            pred[node] = newstate
            ff[node] = (ff[node] + newstate * new_act).astype(np.float32)
            ta[node] = np.float32(ta[node] + new_act)
        fmat = np.concatenate([ff[i] for i in range(n)], axis=0)
        if model.graph_class:
            fmat = fmat.sum(axis=0, keepdims=True)
        for p in range(p_cnt):
            w, b = decs[p]
            logits = fmat @ w + b
            mx = logits.max(axis=-1, keepdims=True)
            sh = logits - mx
            lse = np.log(np.exp(sh).sum(axis=-1, keepdims=True))
            outs[p].append(sh - lse)
    return [np.concatenate(outs[p], axis=0) for p in range(p_cnt)]


# ------------------------------------ main ------------------------------------

if __name__ == "__main__":
    in_features, hidden, out_features = 16, 32, 4
    num_predictions, message_size = 2, 8
    graph_class = False

    root = jax.random.PRNGKey(0)
    k_model, k_x1, k_m1, k_x2, k_m2 = jax.random.split(root, 5)

    model = GwACACT(in_features, hidden, out_features, num_predictions,
                    message_size, graph_class, k_model)

    graph1 = {
        "num_nodes": 5,
        "xa": jax.random.normal(k_x1, (5, in_features), jnp.float32),
        "first_message": jax.random.normal(k_m1, (5, message_size), jnp.float32),
        "edge_index": (np.array([0, 1, 2, 3, 4]), np.array([1, 2, 3, 4, 0])),
        "starts": [True, False, False, False, False],
    }
    graph2 = {
        "num_nodes": 4,
        "xa": jax.random.normal(k_x2, (4, in_features), jnp.float32),
        "first_message": jax.random.normal(k_m2, (4, message_size), jnp.float32),
        "edge_index": (np.array([0, 1, 2]), np.array([1, 2, 3])),
        "starts": [True, False, True, False],
    }

    outputs, zero = model.forward([graph1, graph2])
    outputs = [jax.block_until_ready(o) for o in outputs]

    assert zero == 0
    assert outputs[0].shape == (9, out_features)  # 5 + 4 nodes, per-node readout
    assert all(bool(jnp.all(jnp.isfinite(o))) for o in outputs)

    # numerical check against a host float32 re-implementation of the module
    ref = _reference_forward(model, [graph1, graph2])
    for o, r in zip(outputs, ref):
        np.testing.assert_allclose(np.asarray(o), r, rtol=2e-3, atol=2e-3)

    print("KERNEL_OK")
</pallas_src>

<mosaic_0001>
module attributes {stable_mosaic.version = 11 : i64} {
  func.func @_encoder_kernel(%arg0: memref<16x16xf32, #tpu.memory_space<vmem>>, %arg1: memref<16x128xf32, #tpu.memory_space<vmem>>, %arg2: memref<1x128xf32, #tpu.memory_space<vmem>>, %arg3: memref<16x128xf32, #tpu.memory_space<vmem>>) attributes {dimension_semantics = [], scalar_prefetch = 0 : i64, scratch_operands = 0 : i64, tpu.core_type = #tpu.core_type<tc>} {
    %c0 = arith.constant 0 : index
    %c0_0 = arith.constant 0 : index
    %0 = vector.load %arg0[%c0, %c0_0] : memref<16x16xf32, #tpu.memory_space<vmem>>, vector<16x16xf32>
    %c0_1 = arith.constant 0 : index
    %c0_2 = arith.constant 0 : index
    %1 = vector.load %arg1[%c0_1, %c0_2] : memref<16x128xf32, #tpu.memory_space<vmem>>, vector<16x128xf32>
    %cst = arith.constant dense<0.000000e+00> : vector<16x128xf32>
    %2 = tpu.matmul %0, %1, %cst {dimension_numbers = #tpu.dot_dimension_numbers<[1], [0], [0], [1], [0, 0, 1, 1], [], []>} : vector<16x16xf32>, vector<16x128xf32>, vector<16x128xf32> -> vector<16x128xf32>
    %c0_3 = arith.constant 0 : index
    %c0_4 = arith.constant 0 : index
    %3 = vector.load %arg2[%c0_3, %c0_4] : memref<1x128xf32, #tpu.memory_space<vmem>>, vector<1x128xf32>
    %4 = vector.broadcast %3 : vector<1x128xf32> to vector<16x128xf32>
    %5 = arith.addf %2, %4 : vector<16x128xf32>
    %c0_5 = arith.constant 0 : index
    %c0_6 = arith.constant 0 : index
    %6 = vector.load %arg3[%c0_5, %c0_6] : memref<16x128xf32, #tpu.memory_space<vmem>>, vector<16x128xf32>
    tpu.vector_store %arg3[%c0_5, %c0_6], %5 {strides = array<i32>} : memref<16x128xf32, #tpu.memory_space<vmem>>, vector<16x128xf32>,
    return
  }
}

</mosaic_0001>

<bundles_post_ra>
// kernel: encoder_fwd.1
= control target key start
LH: loop header
LB: loop body
LE: loop exit
PB: predicated region body
PF: predicated region fallthrough
CT: control target
= control target key end

     0   :  { %8 = vsyncpa [#allocation3], 0  ;;  %s287_s0 = inlined_call_operand.hbm [shape: f32[16,16], index: 0, kind: input, shape index: {}]   ;;  %s288_s1 = inlined_call_operand.hbm [shape: f32[16,128], index: 1, kind: input, shape index: {}]   ;;  %s289_s2 = inlined_call_operand.vmem [shape: f32[1,128], index: 2, kind: input, shape index: {}]   ;;  %s290_s3 = inlined_call_operand.hbm [shape: f32[16,128], index: 3, kind: output, shape index: {}]  }
   0x1   :  { %9 = vsyncpa [#allocation6], 0 }
   0x2   :  { %10 = vsyncpa [#allocation4], 0  ;;  %s241_s12 = smov [#allocation2]  }
   0x3   :  { %s16_s13 = sshll.u32 %s241_s12, 4  ;;  %s17_s13 = int_to_ptr.vmem [resolvable:$true] %s16_s13 }
   0x4   :  { %s183_s14 = scalar_lea.vmem %s17_s13, 256  ;;  %p188_p1 = scmp.lt.s32.totalorder %s17_s13, %s17_s13 }
   0x5   :  { %p184_p0 = scmp.ne.s32.totalorder %s17_s13, %s183_s14  ;;  %p189_p2 = scmp.lt.s32.totalorder %s183_s14, %s183_s14 }
   0x7   :  { %p190_p3 = por %p189_p2, %p188_p1 }
   0x9   :  { %p191_p4 = pnand %p190_p3, %p184_p0 }
   0xb   :  { %194 = shalt.err (!%p191_p4)
}
   0xc   :  { %s242_s15 = smov 128   ;;  %s243_s16 = smov 8  }
   0xd   :  { %22 = dma.hbm_to_vmem [thread:$0]  %s287_s0, 256, %s17_s13, [#allocation3], %s242_s15, %s242_s15, %s243_s16  }
   0xe   :  { %s244_s19 = smov [#allocation5]  }
   0xf   :  { %s28_s20 = sshll.u32 %s244_s19, 4  ;;  %s29_s20 = int_to_ptr.vmem [resolvable:$true] %s28_s20 }
  0x10   :  { %s203_s21 = scalar_lea.vmem %s29_s20, 256  ;;  %p208_p6 = scmp.lt.s32.totalorder %s29_s20, %s29_s20 }
  0x11   :  { %p204_p5 = scmp.ne.s32.totalorder %s29_s20, %s203_s21  ;;  %p209_p7 = scmp.lt.s32.totalorder %s203_s21, %s203_s21 }
  0x13   :  { %p210_p8 = por %p209_p7, %p208_p6 }
  0x15   :  { %p211_p9 = pnand %p210_p8, %p204_p5 }
  0x17   :  { %214 = shalt.err (!%p211_p9)
}
  0x18   :  { %34 = dma.hbm_to_vmem [thread:$0]  %s288_s1, 256, %s29_s20, [#allocation6], %s242_s15, %s242_s15, %s243_s16  }
  0x19   :  { %235 = dma.done.wait [#allocation3], 256  }
  0x1a   :  { %236 = vsyncadd [#allocation3], 4294967040 }
  0x1b   :  { %237 = dma.done.wait [#allocation6], 256  }
  0x1c   :  { %238 = vsyncadd [#allocation6], 4294967040  ;;  %vm54_vm0 = vcmask 130048   ;;  %v46_v0 = vld [vmem:[#allocation5 + $0x8] sm:$0xff]  ;;  %v45_v1 = vld [vmem:[#allocation5] sm:$0xff]  ;;  %s245_s1 = smov [#allocation7]  }
  0x1d   :  { %v43_v2 = vld [vmem:[#allocation2] sm:$0xff]  ;;  %163 = vmatprep.subr.mxu0 %v46_v0  ;;  %v44_v3 = vld [vmem:[#allocation2 + $0x8] sm:$0xff]  ;;  %s143_s25 = sshll.u32 %s245_s1, 4  ;;  %s144_s25 = int_to_ptr.vmem [resolvable:$true] %s143_s25 }
  0x1e   :  { %167 = vmatprep.mubr.msk.f32.mxu0 %vm54_vm0, %v43_v2  ;;  %164 = vmatpush3.msra.mxu0 %v46_v0  ;;  %v156_v4 = vld [vmem:[%s289_s2] ss:$0 sm:$0xff]  ;;  %s215_s26 = scalar_lea.vmem %s144_s25, 256  ;;  %p220_p11 = scmp.lt.s32.totalorder %s144_s25, %s144_s25 }
  0x1f   :  { %165 = vmatprep.subr.mxu0 %v45_v1  ;;  %p216_p10 = scmp.ne.s32.totalorder %s144_s25, %s215_s26  ;;  %p221_p12 = scmp.lt.s32.totalorder %s215_s26, %s215_s26 }
  0x20   :  { %166 = vmatpush3.msra.mxu0 %v45_v1 }
  0x21   :  { %168 = vmatmul.mubr.msk.f32.vlgmr.msra.gmra.mxu0 %vm54_vm0, %v44_v3  ;;  %p222_p13 = por %p221_p12, %p220_p11 }
  0x23   :  { %p223_p0 = pnand %p222_p13, %p216_p10 }
  0xe1   :  { %v169_v5 = vpop.f32.mrf.mxu0 }
  0xe2   :  { %v133_v6 = vadd.f32 %v169_v5, %v156_v4 }
  0xe3   :  { %v127_v7 = vpop.f32.mrf.mxu0 }
  0xe4   :  { %137 = vst [vmem:[#allocation7 + $0x8] sm:$0xff] %v133_v6  ;;  %v128_v8 = vadd.f32 %v156_v4, %v127_v7 }
  0xe6   :  { %136 = vst [vmem:[#allocation7] sm:$0xff] %v128_v8 }
  0xe7   :  { %226 = shalt.err (!%p223_p0)
}
  0xe8   :  { %149 = dma.vmem_to_hbm [thread:$0]  %s144_s25, 256, %s290_s3, [#allocation4], %s242_s15, %s242_s15, %s243_s16  }
  0xe9   :  { %239 = dma.done.wait [#allocation4], 256  }
  0xea   :  { %240 = vsyncadd [#allocation4], 4294967040 }
  0xeb   :  { %153 = vsyncpa [#allocation3], 1 }
  0xec   :  { %154 = vsyncpa [#allocation6], 1 }
  0xed   :  { %155 = vsyncpa [#allocation4], 1 }

</bundles_post_ra>
